<compile_context>
chip_gen: v7x
topology: tpu7x:2x2x1
jax: 0.10.0
libtpu: 0.0.40
codegen_flags: <defaults>
</compile_context>

<pallas_src>
import functools as ft

import jax
import jax.numpy as jnp
from jax.experimental import pallas as pl
from jax.experimental.pallas import tpu as pltpu

LANES = 128                         # vreg lane width; last block dim stays a full 128 (unmasked vst)
TARGET_BLOCK_BYTES = 4 * 1024 * 1024  # per-buffer block target; 4 bufs -> 16 MiB working set
VMEM_LIMIT_BYTES = 32 * 1024 * 1024   # safe scoped limit on v5e / v6e / v7x


def _min_sublanes(dtype) -> int:
    """Minimum sublane multiple for clean packed layouts: f32->8, bf16->16, int8/fp8->32."""
    itemsize = jnp.dtype(dtype).itemsize
    return max(8, 32 // max(itemsize, 1))


def _round_up(a: int, b: int) -> int:
    return ((a + b - 1) // b) * b


class PallasLambda:
    """Wraps an arbitrary JAX-traceable elementwise function into a Pallas TPU kernel.

    Mirrors candle's Lambda(nn.Module): forward(x) = fn(x, *fn_args, **fn_kwargs).
    The fn body is traced inside the kernel so the elementwise hot path runs on the
    VPU/EUP over large VMEM tiles streamed from HBM.
    """

    def __init__(self, fn, fn_args=(), fn_kwargs=None):
        if isinstance(fn, ft.partial):
            fn.__name__ = fn.func.__name__
            fn.__qualname__ = fn.func.__qualname__
        self.fn = fn
        self.fn_args = fn_args
        self.fn_kwargs = {} if fn_kwargs is None else fn_kwargs

    def extra_repr(self):
        name = getattr(self.fn, "__qualname__", getattr(self.fn, "__name__", str(self.fn)))
        return f"fn={name}, fn_args={self.fn_args}, fn_kwargs={self.fn_kwargs}"

    def _kernel(self, x_ref, o_ref):
        # Elementwise hot path on the current (blk_rows, 128) VMEM tile.
        o_ref[...] = self.fn(x_ref[...], *self.fn_args, **self.fn_kwargs).astype(o_ref.dtype)

    def __call__(self, x):
        orig_shape = x.shape
        n = x.size
        in_dtype = x.dtype

        # Faithful to the torch module: output dtype is whatever fn produces.
        out_dtype = jax.eval_shape(
            lambda a: self.fn(a, *self.fn_args, **self.fn_kwargs),
            jax.ShapeDtypeStruct((8, LANES), in_dtype),
        ).dtype

        # Dtype-aware tiling: sublane multiple and block rows sized for ~TARGET_BLOCK_BYTES.
        sub = max(_min_sublanes(in_dtype), _min_sublanes(out_dtype))
        max_itemsize = max(jnp.dtype(in_dtype).itemsize, jnp.dtype(out_dtype).itemsize)
        target_rows = max(sub, TARGET_BLOCK_BYTES // (LANES * max_itemsize))
        target_rows -= target_rows % sub

        rows_needed = pl.cdiv(n, LANES)
        if rows_needed <= target_rows:
            blk_rows = _round_up(rows_needed, sub)   # single block covers everything
            rows = blk_rows
        else:
            blk_rows = target_rows                   # large blocks, grid over row-blocks
            rows = _round_up(rows_needed, blk_rows)

        n_pad = rows * LANES
        flat = jnp.ravel(x)
        if n_pad != n:
            # TODO(synk): padded tail is zeros; a wrapped fn undefined at 0 (log, 1/x, ...)
            # computes garbage in the padding region, which is sliced away below.
            flat = jnp.pad(flat, (0, n_pad - n))
        x2d = flat.reshape(rows, LANES)

        out2d = pl.pallas_call(
            self._kernel,
            out_shape=jax.ShapeDtypeStruct((rows, LANES), out_dtype),
            grid=(rows // blk_rows,),
            in_specs=[pl.BlockSpec((blk_rows, LANES), lambda i: (i, 0))],
            out_specs=pl.BlockSpec((blk_rows, LANES), lambda i: (i, 0)),
            compiler_params=pltpu.CompilerParams(
                dimension_semantics=("parallel",),       # lets v7x shard the loop over 2 TCs
                vmem_limit_bytes=VMEM_LIMIT_BYTES,
            ),
        )(x2d)

        if n_pad != n:
            return out2d.reshape(-1)[:n].reshape(orig_shape)
        return out2d.reshape(orig_shape)


def scaled_swish(x, alpha, beta=1.0):
    """Example wrapped fn: beta * x * sigmoid(alpha * x).

    The exp lands on the EUP slot; the single divide per element is negligible since the
    kernel is HBM-bound. (pl.reciprocal is not used so the same fn also runs as the
    plain-JAX reference outside the kernel.)
    """
    return (beta * x) * (1.0 / (1.0 + jnp.exp(-alpha * x)))


if __name__ == "__main__":
    key = jax.random.PRNGKey(0)
    # NCHW, as in PyTorch conv convention: batch=2, channels=4, spatial=16x16.
    x = jax.random.normal(key, (2, 4, 16, 16), dtype=jnp.float32)

    # Lambda wrapping a function with positional args and kwargs, exactly like the
    # torch module: forward(x) = fn(x, *fn_args, **fn_kwargs).
    lam = PallasLambda(scaled_swish, fn_args=(1.5,), fn_kwargs={"beta": 0.75})

    out = jax.block_until_ready(lam(x))

    # Pure-JAX reference check (same fn applied directly).
    ref = scaled_swish(x, 1.5, beta=0.75)
    assert out.shape == x.shape and out.dtype == x.dtype
    assert jnp.allclose(out, ref, atol=1e-5, rtol=1e-5)

    print("KERNEL_OK")
</pallas_src>

<mosaic_0001>
module attributes {stable_mosaic.version = 11 : i64} {
  func.func @_kernel(%arg0: i32, %arg1: memref<16x128xf32, #tpu.memory_space<vmem>>, %arg2: memref<16x128xf32, #tpu.memory_space<vmem>>) attributes {dimension_semantics = [#tpu.dimension_semantics<parallel>], iteration_bounds = array<i64: 1>, scalar_prefetch = 0 : i64, scratch_operands = 0 : i64, tpu.core_type = #tpu.core_type<tc>, window_params = [{transform_indices = @transform_0, window_bounds = array<i64: 16, 128>}, {transform_indices = @transform_1, window_bounds = array<i64: 16, 128>}]} {
    %c0 = arith.constant 0 : index
    %c0_0 = arith.constant 0 : index
    %0 = vector.load %arg1[%c0, %c0_0] : memref<16x128xf32, #tpu.memory_space<vmem>>, vector<16x128xf32>
    %cst = arith.constant 7.500000e-01 : f32
    %1 = vector.broadcast %cst : f32 to vector<16x128xf32>
    %2 = arith.mulf %1, %0 : vector<16x128xf32>
    %cst_1 = arith.constant -1.500000e+00 : f32
    %3 = vector.broadcast %cst_1 : f32 to vector<16x128xf32>
    %4 = arith.mulf %3, %0 : vector<16x128xf32>
    %5 = math.exp %4 : vector<16x128xf32>
    %cst_2 = arith.constant 1.000000e+00 : f32
    %6 = vector.broadcast %cst_2 : f32 to vector<16x128xf32>
    %7 = arith.addf %6, %5 : vector<16x128xf32>
    %cst_3 = arith.constant 1.000000e+00 : f32
    %8 = vector.broadcast %cst_3 : f32 to vector<16x128xf32>
    %9 = arith.divf %8, %7 : vector<16x128xf32>
    %10 = arith.mulf %2, %9 : vector<16x128xf32>
    %c0_4 = arith.constant 0 : index
    %c0_5 = arith.constant 0 : index
    %11 = vector.load %arg2[%c0_4, %c0_5] : memref<16x128xf32, #tpu.memory_space<vmem>>, vector<16x128xf32>
    tpu.vector_store %arg2[%c0_4, %c0_5], %10 {strides = array<i32>} : memref<16x128xf32, #tpu.memory_space<vmem>>, vector<16x128xf32>,
    return
  }
  func.func @transform_0(%arg0: i32) -> (i32, i32) {
    %c0_i32 = arith.constant 0 : i32
    %c0_i32_0 = arith.constant 0 : i32
    return %arg0, %c0_i32 : i32, i32
  }
  func.func @transform_1(%arg0: i32) -> (i32, i32) {
    %c0_i32 = arith.constant 0 : i32
    %c0_i32_0 = arith.constant 0 : i32
    return %arg0, %c0_i32 : i32, i32
  }
}

</mosaic_0001>

<bundles_post_ra>
// kernel: tpu_custom_call.1
= control target key start
LH: loop header
LB: loop body
LE: loop exit
PB: predicated region body
PF: predicated region fallthrough
CT: control target
= control target key end

     0   :  { %6 = vsyncpa [#allocation3], 0  ;;  %s164_s0 = inlined_call_operand.hbm [shape: f32[16,128], index: 0, kind: input, shape index: {}]   ;;  %s165_s1 = inlined_call_operand.hbm [shape: f32[16,128], index: 1, kind: output, shape index: {}]  }
   0x1   :  { %7 = vsyncpa [#allocation4], 0  ;;  %s120_s6 = smov [#allocation2]   ;;  %s72_s10 = scalar_lea.hbm %s164_s0, 256 }
   0x2   :  { %s13_s7 = sshll.u32 %s120_s6, 4  ;;  %p73_p0 = scmp.ne.s32.totalorder %s164_s0, %s72_s10  ;;  %s14_s7 = int_to_ptr.vmem [resolvable:$true] %s13_s7 }
   0x3   :  { %p76_p1 = scmp.lt.u32.totalorder %s72_s10, %s164_s0 }
   0x5   :  { %p78_p2 = pnand %p76_p1, %p73_p0 }
   0x7   :  { %81 = shalt.err (!%p78_p2)
}
   0x8   :  { %s82_s15 = scalar_lea.vmem %s14_s7, 256  ;;  %p87_p4 = scmp.lt.s32.totalorder %s14_s7, %s14_s7 }
   0x9   :  { %p83_p3 = scmp.ne.s32.totalorder %s14_s7, %s82_s15  ;;  %p88_p5 = scmp.lt.s32.totalorder %s82_s15, %s82_s15 }
   0xb   :  { %p89_p6 = por %p88_p5, %p87_p4 }
   0xd   :  { %p90_p7 = pnand %p89_p6, %p83_p3 }
   0xf   :  { %93 = shalt.err (!%p90_p7)
}
  0x10   :  { %s121_s16 = smov 128   ;;  %s122_s17 = smov 8  }
  0x11   :  { %19 = dma.hbm_to_vmem [thread:$0]  %s164_s0, 256, %s14_s7, [#allocation3], %s121_s16, %s121_s16, %s122_s17  }
  0x12   :  { %116 = dma.done.wait [#allocation3], 256  }
  0x13   :  { %117 = vsyncadd [#allocation3], 4294967040  ;;  %v23_v0 = vld [vmem:[#allocation2] sm:$0xff]  ;;  %v24_v1 = vld [vmem:[#allocation2 + $0x8] sm:$0xff]  ;;  %s123_s20 = smov [#allocation5]  }
  0x14   :  { %v27_v2 = vmul.f32 -1.5, %v23_v0  ;;  %v28_v3 = vmul.f32 -1.5, %v24_v1  ;;  %v25_v10 = vmul.f32 0.75, %v23_v0  ;;  %v26_v11 = vmul.f32 0.75, %v24_v1  ;;  %s48_s0 = sshll.u32 %s123_s20, 4  ;;  %s49_s0 = int_to_ptr.vmem [resolvable:$true] %s48_s0 }
  0x15   :  { %s94_s21 = scalar_lea.vmem %s49_s0, 256  ;;  %p99_p9 = scmp.lt.s32.totalorder %s49_s0, %s49_s0 }
  0x16   :  { %v29_v4 = vmul.f32 1.442695, %v27_v2  ;;  %v31_v5 = vmul.f32 1.442695, %v28_v3  ;;  %p95_p8 = scmp.ne.s32.totalorder %s49_s0, %s94_s21  ;;  %p100_p10 = scmp.lt.s32.totalorder %s94_s21, %s94_s21 }
  0x18   :  { %64 = vpow2.f32 %v29_v4  ;;  %p101_p11 = por %p100_p10, %p99_p9 }
  0x19   :  { %66 = vpow2.f32 %v31_v5 }
  0x1a   :  { %p102_p12 = pnand %p101_p11, %p95_p8 }
  0x22   :  { %v65_v6 = vpop.eup %64 }
  0x23   :  { %v67_v7 = vpop.eup %66  ;;  %v33_v8 = vadd.f32 1.0, %v65_v6 }
  0x24   :  { %v34_v9 = vadd.f32 1.0, %v67_v7 }
  0x25   :  { %68 = vrcp.f32 %v33_v8 }
  0x26   :  { %70 = vrcp.f32 %v34_v9 }
  0x2f   :  { %v69_v12 = vpop.eup %68 }
  0x30   :  { %v71_v13 = vpop.eup %70  ;;  %v39_v14 = vmul.f32 %v69_v12, %v25_v10 }
  0x31   :  { %v40_v15 = vmul.f32 %v71_v13, %v26_v11 }
  0x32   :  { %41 = vst [vmem:[#allocation5] sm:$0xff] %v39_v14 }
  0x33   :  { %42 = vst [vmem:[#allocation5 + $0x8] sm:$0xff] %v40_v15 }
  0x34   :  { %105 = shalt.err (!%p102_p12)
}
  0x35   :  { %s106_s24 = scalar_lea.hbm %s165_s1, 256 }
  0x36   :  { %p107_p13 = scmp.ne.s32.totalorder %s165_s1, %s106_s24  ;;  %p110_p0 = scmp.lt.u32.totalorder %s106_s24, %s165_s1 }
  0x38   :  { %p112_p1 = pnand %p110_p0, %p107_p13 }
  0x3a   :  { %115 = shalt.err (!%p112_p1)
}
  0x3b   :  { %54 = dma.vmem_to_hbm [thread:$0]  %s49_s0, 256, %s165_s1, [#allocation4], %s121_s16, %s121_s16, %s122_s17  }
  0x3c   :  { %118 = dma.done.wait [#allocation4], 256  }
  0x3d   :  { %119 = vsyncadd [#allocation4], 4294967040 }
  0x3e   :  { %58 = vsyncpa [#allocation3], 1 }
  0x3f   :  { %59 = vsyncpa [#allocation4], 1 }

</bundles_post_ra>
